<compile_context>
chip_gen: v6e
topology: v6e:2x2x1
jax: 0.10.0
libtpu: 0.0.40
codegen_flags: <defaults>
</compile_context>

<pallas_src>
import functools
import math

import jax
import jax.numpy as jnp
from jax import lax
from jax.experimental import pallas as pl
from jax.experimental.pallas import tpu as pltpu


_NEG_INF = float(-1e30)  # finite: keeps max/exp NaN-free on fully padded rows


# ----------------------------------------------------------------------------
# helpers
# ----------------------------------------------------------------------------
def _round_up(x, m):
    return ((x + m - 1) // m) * m


def _pick_tile(dim, preferred, align):
    """Largest tile <= preferred that divides dim and is a multiple of align.
    Falls back to the full dim (only used on axes where full-dim is safe:
    padded sequence axes are always multiples of 128)."""
    if dim <= preferred:
        return dim
    t = (preferred // align) * align
    while t >= align:
        if dim % t == 0:
            return t
        t -= align
    return dim


def _pick_head_group(n_head, d):
    """Heads processed per flash grid step.  hg*d must be a multiple of 128 so the
    attention output block is lane-dense; aim for ~256 output lanes per block."""
    need = 128 // math.gcd(d, 128)
    target = max(1, 256 // d)
    best = None
    for hg in range(1, n_head + 1):
        if n_head % hg or hg % need:
            continue
        if best is None or abs(hg - target) < abs(best - target):
            best = hg
    if best is None:
        # TODO(synk): support head_dim * n_head combos where no head group gives a
        # 128-lane-aligned block (not hit by any Whisper configuration).
        raise NotImplementedError(
            f"no head group with hg*d % 128 == 0 (n_head={n_head}, head_dim={d})")
    return best


@functools.lru_cache(maxsize=None)
def _vmem_limit():
    """Per-generation scoped-VMEM limit: ~96 MB on 128-MiB parts (v5e/v6e),
    ~48 MB on the 64-MiB v7x."""
    cap = 64 * 1024 * 1024
    try:
        cap = int(pltpu.get_tpu_info().vmem_capacity_bytes)
    except Exception:
        pass
    return int(cap * 3 // 4)


# ----------------------------------------------------------------------------
# full-K tiled matmul + bias:  y[M, N] = x[M, K] @ w[K, N] + b[1, N]
# (K <= n_state <= 1280 for Whisper, so the whole contraction fits in one tile:
#  no reduction grid axis, no accumulator scratch, two purely parallel axes.)
# ----------------------------------------------------------------------------
def _matmul_bias_kernel(x_ref, w_ref, b_ref, o_ref):
    y = jnp.dot(x_ref[...], w_ref[...], preferred_element_type=jnp.float32)
    o_ref[...] = (y + b_ref[...]).astype(o_ref.dtype)


def _matmul_bias(x, w, b, *, tm_pref=256, tn_pref=1024):
    M, K = x.shape
    K2, N = w.shape
    assert K == K2 and b.shape == (1, N)
    itemsize = x.dtype.itemsize
    align_m = 16 if x.dtype == jnp.bfloat16 else 8
    tm = _pick_tile(M, tm_pref, align_m)
    # keep the double-buffered (K, tn) weight tile comfortably inside VMEM
    while tn_pref > 128 and 2 * K * tn_pref * itemsize > 8 * 1024 * 1024:
        tn_pref //= 2
    tn = _pick_tile(N, tn_pref, 128)

    # M innermost so the (K, tn) weight tile (the larger operand) stays resident.
    grid = (N // tn, M // tm)
    return pl.pallas_call(
        _matmul_bias_kernel,
        out_shape=jax.ShapeDtypeStruct((M, N), x.dtype),
        grid_spec=pltpu.PrefetchScalarGridSpec(
            num_scalar_prefetch=0,
            grid=grid,
            in_specs=[
                pl.BlockSpec((tm, K), lambda jn, im: (im, 0)),
                pl.BlockSpec((K, tn), lambda jn, im: (0, jn)),
                pl.BlockSpec((1, tn), lambda jn, im: (0, jn)),
            ],
            out_specs=pl.BlockSpec((tm, tn), lambda jn, im: (im, jn)),
        ),
        compiler_params=pltpu.CompilerParams(
            dimension_semantics=("parallel", "parallel"),
            vmem_limit_bytes=_vmem_limit(),
        ),
    )(x, w, b)


# ----------------------------------------------------------------------------
# flash attention over the fused qkv activation
#   qkv : (B, S_pad, 3*n_state)   [q | k | v] along the last axis, heads contiguous
#   out : (B, S_pad, n_state)     already in the layout the output projection wants
# grid = (B, H//hg, S_pad//tq, S_pad//tk); online softmax over the kv axis.
# ----------------------------------------------------------------------------
def _flash_kernel(q_ref, k_ref, v_ref, o_ref, m_ref, l_ref, acc_ref, *,
                  scale, hg, d, n_ctx, padded, tk, exp_dtype, approx_recip):
    ki = pl.program_id(3)

    @pl.when(ki == 0)
    def _():
        m_ref[...] = jnp.full(m_ref.shape, _NEG_INF, m_ref.dtype)
        l_ref[...] = jnp.zeros_like(l_ref)
        acc_ref[...] = jnp.zeros_like(acc_ref)

    if padded:  # key-padding mask (only generated when the sequence was padded)
        col = ki * tk + lax.broadcasted_iota(jnp.int32, (1, tk), 1)
        key_valid = col < n_ctx                                   # (1, tk)

    for g in range(hg):                      # static loop over the head group
        sl = slice(g * d, (g + 1) * d)       # static lane slice
        q = q_ref[:, sl] * scale             # (tq, d)  1/sqrt(d) folded into q
        k = k_ref[:, sl]                     # (tk, d)
        v = v_ref[:, sl]                     # (tk, d)

        s = lax.dot_general(q, k, (((1,), (1,)), ((), ())),
                            preferred_element_type=jnp.float32)   # (tq, tk) f32
        if padded:
            s = jnp.where(key_valid, s, _NEG_INF)

        m_prev = m_ref[g]                                         # (tq, 1) f32
        m_new = jnp.maximum(m_prev, jnp.max(s, axis=-1, keepdims=True))
        alpha = jnp.exp(m_prev - m_new)                           # (tq, 1) f32
        # bf16 exp on the bf16 path keeps the single EUP slot off the critical path
        p = jnp.exp((s - m_new).astype(exp_dtype))                # (tq, tk)

        l_ref[g] = alpha * l_ref[g] + jnp.sum(
            p.astype(jnp.float32), axis=-1, keepdims=True)
        pv = lax.dot_general(p.astype(v.dtype), v, (((1,), (0,)), ((), ())),
                             preferred_element_type=jnp.float32)  # (tq, d) f32
        acc_ref[g] = alpha * acc_ref[g] + pv
        m_ref[g] = m_new

    @pl.when(ki == pl.num_programs(3) - 1)
    def _():
        # lane-dense finalize: pack the hg heads into the (tq, hg*d) output block
        for g in range(hg):
            l = l_ref[g]
            inv_l = pl.reciprocal(l, approx=True) if approx_recip else 1.0 / l
            o_ref[:, g * d:(g + 1) * d] = (acc_ref[g] * inv_l).astype(o_ref.dtype)


def _flash_attention(qkv, *, n_head, head_dim, n_ctx, softmax_exp_dtype=None,
                     tq_pref=512, tk_pref=512):
    B, S_pad, three_n = qkv.shape
    d = head_dim
    n_state = n_head * d
    assert three_n == 3 * n_state
    dtype = qkv.dtype

    hg = _pick_head_group(n_head, d)
    hb = n_head // hg                         # number of head-group blocks
    # S_pad is a multiple of 128, so these never fall back to the full axis.
    tq = _pick_tile(S_pad, tq_pref, 128)
    tk = _pick_tile(S_pad, tk_pref, 128)

    if softmax_exp_dtype is None:
        # bf16 exp relieves the EUP on v6e/v7x; pass jnp.float32 explicitly on v5e
        # (no bf16 EUP) or when strict accuracy is required.
        softmax_exp_dtype = jnp.bfloat16 if dtype == jnp.bfloat16 else jnp.float32

    kernel = functools.partial(
        _flash_kernel,
        scale=1.0 / math.sqrt(d), hg=hg, d=d, n_ctx=n_ctx,
        padded=(S_pad != n_ctx), tk=tk, exp_dtype=softmax_exp_dtype,
        approx_recip=(dtype == jnp.bfloat16))

    blk_q = (pl.Squeezed(), tq, hg * d)
    blk_kv = (pl.Squeezed(), tk, hg * d)
    grid = (B, hb, S_pad // tq, S_pad // tk)

    return pl.pallas_call(
        kernel,
        out_shape=jax.ShapeDtypeStruct((B, S_pad, n_state), dtype),
        grid_spec=pltpu.PrefetchScalarGridSpec(
            num_scalar_prefetch=0,
            grid=grid,
            in_specs=[
                # q / k / v head-group blocks read straight out of the fused qkv
                # activation via lane offsets -> no XLA split / transpose.
                pl.BlockSpec(blk_q, lambda b, h, qi, ki: (b, qi, h)),
                pl.BlockSpec(blk_kv, lambda b, h, qi, ki: (b, ki, hb + h)),
                pl.BlockSpec(blk_kv, lambda b, h, qi, ki: (b, ki, 2 * hb + h)),
            ],
            out_specs=pl.BlockSpec((pl.Squeezed(), tq, hg * d),
                                   lambda b, h, qi, ki: (b, qi, h)),
            scratch_shapes=[
                pltpu.VMEM((hg, tq, 1), jnp.float32),   # running max m
                pltpu.VMEM((hg, tq, 1), jnp.float32),   # running denom l
                pltpu.VMEM((hg, tq, d), jnp.float32),   # output accumulator
            ],
        ),
        compiler_params=pltpu.CompilerParams(
            dimension_semantics=("parallel", "parallel", "parallel", "arbitrary"),
            vmem_limit_bytes=_vmem_limit(),
        ),
    )(qkv, qkv, qkv)


# ----------------------------------------------------------------------------
# public API
# ----------------------------------------------------------------------------
def prepare_mha_params(params, dtype=jnp.float32):
    """One-time weight preparation (hoisted out of the forward path):
    transpose to (in, out), fuse [Wq|Wk|Wv] / [bq|0|bv], cast to the compute dtype."""
    wq_t = jnp.asarray(params["wq"]).T
    wk_t = jnp.asarray(params["wk"]).T
    wv_t = jnp.asarray(params["wv"]).T
    bq = jnp.asarray(params["bq"])
    bv = jnp.asarray(params["bv"])
    n_state = wq_t.shape[0]
    w_qkv = jnp.concatenate([wq_t, wk_t, wv_t], axis=1).astype(dtype)   # (S, 3S)
    b_qkv = jnp.concatenate([bq, jnp.zeros_like(bq), bv]
                            ).astype(dtype).reshape(1, 3 * n_state)
    wo_t = jnp.asarray(params["wo"]).T.astype(dtype)
    bo = jnp.asarray(params["bo"]).astype(dtype).reshape(1, n_state)
    return {"w_qkv": w_qkv, "b_qkv": b_qkv, "wo_t": wo_t, "bo": bo}


def multi_head_attention(x, prepared, n_head, *, softmax_exp_dtype=None):
    """Whisper MultiHeadAttention.forward(x) — self-attention, SDPA branch.
    Returns (out, qk) with qk=None (use_sdpa=True path of the reference module).

    TODO(synk): mask / kv_cache / cross-attention (xa) paths are not implemented.
    """
    B, n_ctx, n_state = x.shape
    assert n_state % n_head == 0, "n_state must be divisible by n_head"
    d = n_state // n_head
    dtype = x.dtype
    assert prepared["w_qkv"].dtype == dtype, \
        "prepare_mha_params must be called with the activation dtype"

    # Pad the sequence to a multiple of 128 so every tile divides evenly
    # (Whisper n_ctx=1500 -> 1536); padded key columns are masked in-kernel.
    S_pad = _round_up(n_ctx, 128)
    if S_pad != n_ctx:
        x = jnp.pad(x, ((0, 0), (0, S_pad - n_ctx), (0, 0)))

    x2d = x.reshape(B * S_pad, n_state)
    qkv = _matmul_bias(x2d, prepared["w_qkv"], prepared["b_qkv"])   # (B*S_pad, 3S)

    attn = _flash_attention(qkv.reshape(B, S_pad, 3 * n_state),
                            n_head=n_head, head_dim=d, n_ctx=n_ctx,
                            softmax_exp_dtype=softmax_exp_dtype)    # (B, S_pad, S)

    out = _matmul_bias(attn.reshape(B * S_pad, n_state),
                       prepared["wo_t"], prepared["bo"])
    out = out.reshape(B, S_pad, n_state)[:, :n_ctx]
    return out, None   # qk is None in the SDPA path of the reference module


# ----------------------------------------------------------------------------
# pure-JAX reference (exact softmax)
# ----------------------------------------------------------------------------
def _reference(x, params, n_head):
    B, n_ctx, n_state = x.shape
    d = n_state // n_head
    q = x @ params["wq"].T + params["bq"]
    k = x @ params["wk"].T
    v = x @ params["wv"].T + params["bv"]

    def split(t):  # (B, S, n_state) -> (B, H, S, d)
        return t.reshape(B, n_ctx, n_head, d).transpose(0, 2, 1, 3)

    qh, kh, vh = split(q), split(k), split(v)
    s = jnp.einsum("bhqd,bhkd->bhqk", qh, kh) / math.sqrt(d)
    w = jax.nn.softmax(s, axis=-1)
    o = jnp.einsum("bhqk,bhkd->bhqd", w, vh)
    o = o.transpose(0, 2, 1, 3).reshape(B, n_ctx, n_state)
    return o @ params["wo"].T + params["bo"]


if __name__ == "__main__":
    B, n_ctx, n_state, n_head = 2, 8, 128, 4

    key = jax.random.PRNGKey(0)
    keys = jax.random.split(key, 8)
    w_scale = 1.0 / math.sqrt(n_state)
    params = {
        "wq": jax.random.normal(keys[0], (n_state, n_state), jnp.float32) * w_scale,
        "bq": jax.random.normal(keys[1], (n_state,), jnp.float32) * 0.1,
        "wk": jax.random.normal(keys[2], (n_state, n_state), jnp.float32) * w_scale,
        "wv": jax.random.normal(keys[3], (n_state, n_state), jnp.float32) * w_scale,
        "bv": jax.random.normal(keys[4], (n_state,), jnp.float32) * 0.1,
        "wo": jax.random.normal(keys[5], (n_state, n_state), jnp.float32) * w_scale,
        "bo": jax.random.normal(keys[6], (n_state,), jnp.float32) * 0.1,
    }
    x = jax.random.normal(keys[7], (B, n_ctx, n_state), jnp.float32)

    ref = _reference(x, params, n_head)

    # f32 path: exact reciprocal, f32 softmax exp.
    prep_f32 = prepare_mha_params(params, jnp.float32)       # hoisted, done once
    out, qk = multi_head_attention(x, prep_f32, n_head)
    out = jax.block_until_ready(out)
    assert out.shape == (B, n_ctx, n_state)
    assert qk is None
    assert jnp.allclose(out, ref, atol=2e-2, rtol=2e-2), "f32 mismatch vs reference"

    # bf16 path (performance configuration): bf16 MXU inputs, f32 accumulation,
    # bf16 softmax exp, approx reciprocal.
    prep_bf16 = prepare_mha_params(params, jnp.bfloat16)      # hoisted, done once
    out_bf16, _ = multi_head_attention(x.astype(jnp.bfloat16), prep_bf16, n_head)
    out_bf16 = jax.block_until_ready(out_bf16)
    assert jnp.allclose(out_bf16.astype(jnp.float32), ref,
                        atol=1.5e-1, rtol=1.5e-1), "bf16 mismatch vs reference"

    print("KERNEL_OK")
</pallas_src>

<mosaic_0001>
module attributes {stable_mosaic.version = 11 : i64} {
  func.func @_matmul_bias_kernel(%arg0: i32, %arg1: i32, %arg2: memref<256x128xf32, #tpu.memory_space<vmem>>, %arg3: memref<128x384xf32, #tpu.memory_space<vmem>>, %arg4: memref<1x384xf32, #tpu.memory_space<vmem>>, %arg5: memref<256x384xf32, #tpu.memory_space<vmem>>) attributes {dimension_semantics = [#tpu.dimension_semantics<parallel>, #tpu.dimension_semantics<parallel>], iteration_bounds = array<i64: 1, 1>, scalar_prefetch = 0 : i64, scratch_operands = 0 : i64, tpu.core_type = #tpu.core_type<tc>, window_params = [{transform_indices = @transform_0, window_bounds = array<i64: 256, 128>}, {transform_indices = @transform_1, window_bounds = array<i64: 128, 384>}, {transform_indices = @transform_2, window_bounds = array<i64: 1, 384>}, {transform_indices = @transform_3, window_bounds = array<i64: 256, 384>}]} {
    %c0 = arith.constant 0 : index
    %c0_0 = arith.constant 0 : index
    %0 = vector.load %arg2[%c0, %c0_0] : memref<256x128xf32, #tpu.memory_space<vmem>>, vector<256x128xf32>
    %c0_1 = arith.constant 0 : index
    %c0_2 = arith.constant 0 : index
    %1 = vector.load %arg3[%c0_1, %c0_2] : memref<128x384xf32, #tpu.memory_space<vmem>>, vector<128x384xf32>
    %cst = arith.constant dense<0.000000e+00> : vector<256x384xf32>
    %2 = tpu.matmul %0, %1, %cst {dimension_numbers = #tpu.dot_dimension_numbers<[1], [0], [0], [1], [0, 0, 1, 1], [], []>} : vector<256x128xf32>, vector<128x384xf32>, vector<256x384xf32> -> vector<256x384xf32>
    %c0_3 = arith.constant 0 : index
    %c0_4 = arith.constant 0 : index
    %3 = vector.load %arg4[%c0_3, %c0_4] : memref<1x384xf32, #tpu.memory_space<vmem>>, vector<1x384xf32>
    %4 = vector.broadcast %3 : vector<1x384xf32> to vector<256x384xf32>
    %5 = arith.addf %2, %4 : vector<256x384xf32>
    %c0_5 = arith.constant 0 : index
    %c0_6 = arith.constant 0 : index
    %6 = vector.load %arg5[%c0_5, %c0_6] : memref<256x384xf32, #tpu.memory_space<vmem>>, vector<256x384xf32>
    tpu.vector_store %arg5[%c0_5, %c0_6], %5 {strides = array<i32>} : memref<256x384xf32, #tpu.memory_space<vmem>>, vector<256x384xf32>,
    return
  }
  func.func @transform_0(%arg0: i32, %arg1: i32) -> (i32, i32) {
    %c0_i32 = arith.constant 0 : i32
    %c0_i32_0 = arith.constant 0 : i32
    return %arg1, %c0_i32 : i32, i32
  }
  func.func @transform_1(%arg0: i32, %arg1: i32) -> (i32, i32) {
    %c0_i32 = arith.constant 0 : i32
    %c0_i32_0 = arith.constant 0 : i32
    return %c0_i32, %arg0 : i32, i32
  }
  func.func @transform_2(%arg0: i32, %arg1: i32) -> (i32, i32) {
    %c0_i32 = arith.constant 0 : i32
    %c0_i32_0 = arith.constant 0 : i32
    return %c0_i32, %arg0 : i32, i32
  }
  func.func @transform_3(%arg0: i32, %arg1: i32) -> (i32, i32) {
    %c0_i32 = arith.constant 0 : i32
    return %arg1, %arg0 : i32, i32
  }
}

</mosaic_0001>

<bundles_post_ra>
// kernel: tpu_custom_call.1
= control target key start
LH: loop header
LB: loop body
LE: loop exit
PB: predicated region body
PF: predicated region fallthrough
CT: control target
= control target key end

     0   :  { %8 = vsyncpa [#allocation3], 0  ;;  %s1208_s0 = inlined_call_operand.hbm [shape: f32[256,128], index: 0, kind: input, shape index: {}]   ;;  %s1209_s1 = inlined_call_operand.hbm [shape: f32[128,384], index: 1, kind: input, shape index: {}]   ;;  %s1210_s2 = inlined_call_operand.vmem [shape: f32[1,384], index: 2, kind: input, shape index: {}]   ;;  %s1211_s3 = inlined_call_operand.hbm [shape: f32[256,384], index: 3, kind: output, shape index: {}]  }
   0x1   :  { %9 = vsyncpa [#allocation6], 0 }
   0x2   :  { %10 = vsyncpa [#allocation4], 0  ;;  %s970_s12 = smov [#allocation2]  }
   0x3   :  { %s16_s13 = sshll.u32 %s970_s12, 4  ;;  %s17_s13 = int_to_ptr.vmem [resolvable:$true] %s16_s13 }
   0x4   :  { %s912_s14 = scalar_lea.vmem %s17_s13, 4096  ;;  %p917_p1 = scmp.lt.s32.totalorder %s17_s13, %s17_s13 }
   0x5   :  { %p913_p0 = scmp.ne.s32.totalorder %s17_s13, %s912_s14  ;;  %p918_p2 = scmp.lt.s32.totalorder %s912_s14, %s912_s14 }
   0x7   :  { %p919_p3 = por %p918_p2, %p917_p1 }
   0x9   :  { %p920_p4 = pnand %p919_p3, %p913_p0 }
   0xb   :  { %923 = shalt.err (!%p920_p4)
}
   0xc   :  { %s971_s15 = smov 128   ;;  %s972_s16 = smov 8  }
   0xd   :  { %22 = dma.hbm_to_vmem [thread:$0]  %s1208_s0, 4096, %s17_s13, [#allocation3], %s971_s15, %s971_s15, %s972_s16  }
   0xe   :  { %s973_s19 = smov [#allocation5]  }
   0xf   :  { %s28_s20 = sshll.u32 %s973_s19, 4  ;;  %s29_s20 = int_to_ptr.vmem [resolvable:$true] %s28_s20 }
  0x10   :  { %s932_s21 = scalar_lea.vmem %s29_s20, 6144  ;;  %p937_p6 = scmp.lt.s32.totalorder %s29_s20, %s29_s20 }
  0x11   :  { %p933_p5 = scmp.ne.s32.totalorder %s29_s20, %s932_s21  ;;  %p938_p7 = scmp.lt.s32.totalorder %s932_s21, %s932_s21 }
  0x13   :  { %p939_p8 = por %p938_p7, %p937_p6 }
  0x15   :  { %p940_p9 = pnand %p939_p8, %p933_p5 }
  0x17   :  { %943 = shalt.err (!%p940_p9)
}
  0x18   :  { %s974_s22 = smov 384   ;;  %s975_s23 = smov 24  }
  0x19   :  { %34 = dma.hbm_to_vmem [thread:$0]  %s1209_s1, 6144, %s29_s20, [#allocation6], %s974_s22, %s974_s22, %s975_s23  }
  0x1a   :  { %964 = dma.done.wait [#allocation3], 4096  }
  0x1b   :  { %965 = vsyncadd [#allocation3], 4294963200 }
  0x1c   :  { %966 = dma.done.wait [#allocation6], 6144  }
  0x1d   :  { %967 = vsyncadd [#allocation6], 4294961152  ;;  %v976_v0 = vmov 0.0   ;;  %v121_v1 = vld [vmem:[#allocation5 + $0x170] sm:$0xff]  ;;  %v120_v2 = vld [vmem:[#allocation5 + $0x168] sm:$0xff] }
  0x1e   :  { %204 = vmatprep.mubr.f32.mxu0 %v976_v0  ;;  %348 = vmatprep.mubr.f32.mxu1 %v976_v0  ;;  %v118_v3 = vld [vmem:[#allocation5 + $0x158] sm:$0xff]  ;;  %v117_v4 = vld [vmem:[#allocation5 + $0x150] sm:$0xff]  ;;  %v115_v5 = vld [vmem:[#allocation5 + $0x140] sm:$0xff] }
  0x1f   :  { %140 = vmatprep.subr.mxu0 %v121_v1  ;;  %864 = vmatprep.subr.mxu1 %v121_v1  ;;  %v114_v6 = vld [vmem:[#allocation5 + $0x138] sm:$0xff]  ;;  %v112_v7 = vld [vmem:[#allocation5 + $0x128] sm:$0xff]  ;;  %v111_v8 = vld [vmem:[#allocation5 + $0x120] sm:$0xff] }
  0x20   :  { %141 = vmatpush1.msra.mxu0 %v120_v2  ;;  %880 = vmatpush1.msra.mxu1 %v120_v2  ;;  %v109_v9 = vld [vmem:[#allocation5 + $0x110] sm:$0xff]  ;;  %v108_v10 = vld [vmem:[#allocation5 + $0x108] sm:$0xff]  ;;  %v106_v11 = vld [vmem:[#allocation5 + $0xf8] sm:$0xff] }
  0x21   :  { %142 = vmatprep.subr.mxu0 %v118_v3  ;;  %865 = vmatprep.subr.mxu1 %v118_v3  ;;  %v105_v12 = vld [vmem:[#allocation5 + $0xf0] sm:$0xff]  ;;  %v103_v13 = vld [vmem:[#allocation5 + $0xe0] sm:$0xff]  ;;  %v102_v14 = vld [vmem:[#allocation5 + $0xd8] sm:$0xff] }
  0x22   :  { %143 = vmatpush1.msra.mxu0 %v117_v4  ;;  %881 = vmatpush1.msra.mxu1 %v117_v4  ;;  %v100_v15 = vld [vmem:[#allocation5 + $0xc8] sm:$0xff]  ;;  %v99_v16 = vld [vmem:[#allocation5 + $0xc0] sm:$0xff]  ;;  %v97_v17 = vld [vmem:[#allocation5 + $0xb0] sm:$0xff] }
  0x23   :  { %144 = vmatprep.subr.mxu0 %v115_v5  ;;  %866 = vmatprep.subr.mxu1 %v115_v5  ;;  %v96_v18 = vld [vmem:[#allocation5 + $0xa8] sm:$0xff]  ;;  %v94_v19 = vld [vmem:[#allocation5 + $0x98] sm:$0xff]  ;;  %v93_v20 = vld [vmem:[#allocation5 + $0x90] sm:$0xff] }
  0x24   :  { %145 = vmatpush1.msra.mxu0 %v114_v6  ;;  %882 = vmatpush1.msra.mxu1 %v114_v6  ;;  %v91_v21 = vld [vmem:[#allocation5 + $0x80] sm:$0xff]  ;;  %v90_v22 = vld [vmem:[#allocation5 + $0x78] sm:$0xff]  ;;  %v88_v23 = vld [vmem:[#allocation5 + $0x68] sm:$0xff] }
  0x25   :  { %146 = vmatprep.subr.mxu0 %v112_v7  ;;  %867 = vmatprep.subr.mxu1 %v112_v7  ;;  %v87_v24 = vld [vmem:[#allocation5 + $0x60] sm:$0xff]  ;;  %v85_v25 = vld [vmem:[#allocation5 + $0x50] sm:$0xff]  ;;  %v84_v26 = vld [vmem:[#allocation5 + $0x48] sm:$0xff] }
  0x26   :  { %147 = vmatpush1.msra.mxu0 %v111_v8  ;;  %883 = vmatpush1.msra.mxu1 %v111_v8  ;;  %v82_v27 = vld [vmem:[#allocation5 + $0x38] sm:$0xff]  ;;  %v81_v28 = vld [vmem:[#allocation5 + $0x30] sm:$0xff]  ;;  %v79_v29 = vld [vmem:[#allocation5 + $0x20] sm:$0xff] }
  0x27   :  { %148 = vmatprep.subr.mxu0 %v109_v9  ;;  %868 = vmatprep.subr.mxu1 %v109_v9  ;;  %v78_v30 = vld [vmem:[#allocation5 + $0x18] sm:$0xff]  ;;  %v76_v31 = vld [vmem:[#allocation5 + $0x8] sm:$0xff]  ;;  %v75_v32 = vld [vmem:[#allocation5] sm:$0xff] }
  0x28   :  { %149 = vmatpush1.msra.mxu0 %v108_v10  ;;  %884 = vmatpush1.msra.mxu1 %v108_v10  ;;  %v1009_v33 = vld [vmem:[#allocation2] sm:$0xff]  ;;  %v122_v35 = vld [vmem:[#allocation5 + $0x178] sm:$0xff]  ;;  %v1016_v37 = vld [vmem:[#allocation2 + $0x8] sm:$0xff] }
  0x29   :  { %150 = vmatprep.subr.mxu0 %v106_v11  ;;  %869 = vmatprep.subr.mxu1 %v106_v11  ;;  %v1011_v34 = vld [vmem:[#allocation2 + $0xc0] sm:$0xff]  ;;  %v1019_v38 = vld [vmem:[#allocation2 + $0xc8] sm:$0xff]  ;;  %v113_v40 = vld [vmem:[#allocation5 + $0x130] sm:$0xff] }
  0x2a   :  { %151 = vmatpush1.msra.mxu0 %v105_v12  ;;  %885 = vmatpush1.msra.mxu1 %v105_v12  ;;  %v119_v36 = vld [vmem:[#allocation5 + $0x160] sm:$0xff]  ;;  %v116_v39 = vld [vmem:[#allocation5 + $0x148] sm:$0xff]  ;;  %v1023_v41 = vld [vmem:[#allocation2 + $0x10] sm:$0xff] }
  0x2b   :  { %152 = vmatprep.subr.mxu0 %v103_v13  ;;  %870 = vmatprep.subr.mxu1 %v103_v13  ;;  %v1026_v42 = vld [vmem:[#allocation2 + $0xd0] sm:$0xff]  ;;  %v110_v43 = vld [vmem:[#allocation5 + $0x118] sm:$0xff]  ;;  %v107_v44 = vld [vmem:[#allocation5 + $0x100] sm:$0xff] }
  0x2c   :  { %153 = vmatpush1.msra.mxu0 %v102_v14  ;;  %886 = vmatpush1.msra.mxu1 %v102_v14  ;;  %v1031_v45 = vld [vmem:[#allocation2 + $0x18] sm:$0xff]  ;;  %v104_v47 = vld [vmem:[#allocation5 + $0xe8] sm:$0xff]  ;;  %v101_v48 = vld [vmem:[#allocation5 + $0xd0] sm:$0xff] }
  0x2d   :  { %154 = vmatprep.subr.mxu0 %v100_v15  ;;  %871 = vmatprep.subr.mxu1 %v100_v15  ;;  %v1034_v46 = vld [vmem:[#allocation2 + $0xd8] sm:$0xff]  ;;  %v47_v49 = vld [vmem:[#allocation2 + $0x20] sm:$0xff]  ;;  %v48_v53 = vld [vmem:[#allocation2 + $0x28] sm:$0xff] }
  0x2e   :  { %155 = vmatpush1.msra.mxu0 %v99_v16  ;;  %887 = vmatpush1.msra.mxu1 %v99_v16  ;;  %v1040_v50 = vld [vmem:[#allocation2 + $0xe0] sm:$0xff]  ;;  %v98_v51 = vld [vmem:[#allocation5 + $0xb8] sm:$0xff]  ;;  %v1045_v54 = vld [vmem:[#allocation2 + $0xe8] sm:$0xff] }
  0x2f   :  { %156 = vmatprep.subr.mxu0 %v97_v17  ;;  %872 = vmatprep.subr.mxu1 %v97_v17  ;;  %v95_v52 = vld [vmem:[#allocation5 + $0xa0] sm:$0xff]  ;;  %v92_v55 = vld [vmem:[#allocation5 + $0x88] sm:$0xff]  ;;  %v89_v56 = vld [vmem:[#allocation5 + $0x70] sm:$0xff] }
  0x30   :  { %157 = vmatpush1.msra.mxu0 %v96_v18  ;;  %888 = vmatpush1.msra.mxu1 %v96_v18  ;;  %v49_v57 = vld [vmem:[#allocation2 + $0x30] sm:$0xff]  ;;  %v86_v59 = vld [vmem:[#allocation5 + $0x58] sm:$0xff]  ;;  %v83_v60 = vld [vmem:[#allocation5 + $0x40] sm:$0xff]  ;;  %v125_v18 = vlaneseq }
  0x31   :  { %158 = vmatprep.subr.mxu0 %v94_v19  ;;  %873 = vmatprep.subr.mxu1 %v94_v19  ;;  %v1050_v58 = vld [vmem:[#allocation2 + $0xf0] sm:$0xff]  ;;  %v50_v61 = vld [vmem:[#allocation2 + $0x38] sm:$0xff]  ;;  %v80_v63 = vld [vmem:[#allocation5 + $0x28] sm:$0xff] }
  0x32   :  { %159 = vmatpush1.msra.mxu0 %v93_v20  ;;  %889 = vmatpush1.msra.mxu1 %v93_v20  ;;  %v1055_v62 = vld [vmem:[#allocation2 + $0xf8] sm:$0xff]  ;;  %v77_v1 = vld [vmem:[#allocation5 + $0x10] sm:$0xff]  ;;  %v51_v2 = vld [vmem:[#allocation2 + $0x40] sm:$0xff]  ;;  %v1087_v19 = vshrl.u32 %v125_v18, 7 }
  0x33   :  { %160 = vmatprep.subr.mxu0 %v91_v21  ;;  %874 = vmatprep.subr.mxu1 %v91_v21  ;;  %v52_v3 = vld [vmem:[#allocation2 + $0x48] sm:$0xff]  ;;  %v53_v4 = vld [vmem:[#allocation2 + $0x50] sm:$0xff]  ;;  %v54_v5 = vld [vmem:[#allocation2 + $0x58] sm:$0xff] }
  0x34   :  { %161 = vmatpush1.msra.mxu0 %v90_v22  ;;  %890 = vmatpush1.msra.mxu1 %v90_v22  ;;  %v55_v6 = vld [vmem:[#allocation2 + $0x60] sm:$0xff]  ;;  %v56_v7 = vld [vmem:[#allocation2 + $0x68] sm:$0xff]  ;;  %v57_v8 = vld [vmem:[#allocation2 + $0x70] sm:$0xff]  ;;  %v127_v20 = vsub.s32 0, %v1087_v19  ;;  %v131_v22 = vsub.s32 1, %v1087_v19 }
  0x35   :  { %162 = vmatprep.subr.mxu0 %v88_v23  ;;  %875 = vmatprep.subr.mxu1 %v88_v23  ;;  %v58_v9 = vld [vmem:[#allocation2 + $0x78] sm:$0xff]  ;;  %v59_v10 = vld [vmem:[#allocation2 + $0x80] sm:$0xff]  ;;  %v60_v11 = vld [vmem:[#allocation2 + $0x88] sm:$0xff] }
  0x36   :  { %163 = vmatpush1.msra.mxu0 %v87_v24  ;;  %891 = vmatpush1.msra.mxu1 %v87_v24  ;;  %v61_v12 = vld [vmem:[#allocation2 + $0x90] sm:$0xff]  ;;  %v62_v13 = vld [vmem:[#allocation2 + $0x98] sm:$0xff]  ;;  %v63_v14 = vld [vmem:[#allocation2 + $0xa0] sm:$0xff] }
  0x37   :  { %164 = vmatprep.subr.mxu0 %v85_v25  ;;  %876 = vmatprep.subr.mxu1 %v85_v25  ;;  %v64_v15 = vld [vmem:[#allocation2 + $0xa8] sm:$0xff]  ;;  %v65_v16 = vld [vmem:[#allocation2 + $0xb0] sm:$0xff]  ;;  %v66_v17 = vld [vmem:[#allocation2 + $0xb8] sm:$0xff] }
  0x38   :  { %165 = vmatpush1.msra.mxu0 %v84_v26  ;;  %892 = vmatpush1.msra.mxu1 %v84_v26  ;;  %v1093_v21 = vld [vmem:[%s1210_s2] sm:$0x7]  ;;  %s977_s2 = smov [#allocation7]  }
  0x39   :  { %166 = vmatprep.subr.mxu0 %v82_v27  ;;  %877 = vmatprep.subr.mxu1 %v82_v27  ;;  %v1097_v23 = vrot.slane %v1093_v21, %v127_v20  ;;  %s723_s26 = sshll.u32 %s977_s2, 4  ;;  %s724_s26 = int_to_ptr.vmem [resolvable:$true] %s723_s26 }
  0x3a   :  { %167 = vmatpush1.msra.mxu0 %v81_v28  ;;  %893 = vmatpush1.msra.mxu1 %v81_v28  ;;  %s944_s27 = scalar_lea.vmem %s724_s26, 12288  ;;  %p949_p11 = scmp.lt.s32.totalorder %s724_s26, %s724_s26 }
  0x3b   :  { %168 = vmatprep.subr.mxu0 %v79_v29  ;;  %878 = vmatprep.subr.mxu1 %v79_v29  ;;  %p945_p10 = scmp.ne.s32.totalorder %s724_s26, %s944_s27  ;;  %p950_p12 = scmp.lt.s32.totalorder %s944_s27, %s944_s27 }
  0x3c   :  { %169 = vmatpush1.msra.mxu0 %v78_v30  ;;  %894 = vmatpush1.msra.mxu1 %v78_v30 }
  0x3d   :  { %170 = vmatprep.subr.mxu0 %v76_v31  ;;  %879 = vmatprep.subr.mxu1 %v76_v31  ;;  %p951_p13 = por %p950_p12, %p949_p11 }
  0x3e   :  { %171 = vmatpush1.msra.mxu0 %v75_v32  ;;  %895 = vmatpush1.msra.mxu1 %v75_v32 }
  0x3f   :  { %205 = vmatmul.mubr.f32.vlgmr.msra.gmra.mxu0 %v1009_v33  ;;  %349 = vmatmul.mubr.f32.vlgmr.msra.gmra.mxu1 %v1011_v34  ;;  %p952_p0 = pnand %p951_p13, %p945_p10 }
  0x40   :  { %784 = vmatprep.subr.mxu1 %v122_v35  ;;  %210 = vmatprep.mubr.f32.mxu0 %v976_v0 }
  0x41   :  { %785 = vmatpush3.msra.mxu1 %v122_v35  ;;  %354 = vmatprep.mubr.f32.mxu1 %v976_v0 }
  0x42   :  { %786 = vmatprep.subr.mxu1 %v119_v36 }
  0x43   :  { %787 = vmatpush3.msra.mxu1 %v119_v36  ;;  %211 = vmatmul.mubr.f32.gmra.mxu0 %v1016_v37 }
  0x44   :  { %355 = vmatmul.mubr.f32.gmra.mxu1 %v1019_v38  ;;  %788 = vmatprep.subr.mxu1 %v116_v39 }
  0x45   :  { %789 = vmatpush3.msra.mxu1 %v116_v39  ;;  %216 = vmatprep.mubr.f32.mxu0 %v976_v0 }
  0x46   :  { %790 = vmatprep.subr.mxu1 %v113_v40  ;;  %360 = vmatprep.mubr.f32.mxu1 %v976_v0 }
  0x47   :  { %791 = vmatpush3.msra.mxu1 %v113_v40  ;;  %217 = vmatmul.mubr.f32.gmra.mxu0 %v1023_v41 }
  0x48   :  { %361 = vmatmul.mubr.f32.gmra.mxu1 %v1026_v42  ;;  %792 = vmatprep.subr.mxu1 %v110_v43 }
  0x49   :  { %793 = vmatpush3.msra.mxu1 %v110_v43  ;;  %222 = vmatprep.mubr.f32.mxu0 %v976_v0 }
  0x4a   :  { %794 = vmatprep.subr.mxu1 %v107_v44  ;;  %366 = vmatprep.mubr.f32.mxu1 %v976_v0 }
  0x4b   :  { %795 = vmatpush3.msra.mxu1 %v107_v44  ;;  %223 = vmatmul.mubr.f32.gmra.mxu0 %v1031_v45 }
  0x4c   :  { %367 = vmatmul.mubr.f32.gmra.mxu1 %v1034_v46  ;;  %796 = vmatprep.subr.mxu1 %v104_v47 }
  0x4d   :  { %797 = vmatpush3.msra.mxu1 %v104_v47  ;;  %228 = vmatprep.mubr.f32.mxu0 %v976_v0 }
  0x4e   :  { %798 = vmatprep.subr.mxu1 %v101_v48  ;;  %372 = vmatprep.mubr.f32.mxu1 %v976_v0 }
  0x4f   :  { %799 = vmatpush3.msra.mxu1 %v101_v48  ;;  %229 = vmatmul.mubr.f32.gmra.mxu0 %v47_v49 }
  0x50   :  { %373 = vmatmul.mubr.f32.gmra.mxu1 %v1040_v50  ;;  %800 = vmatprep.subr.mxu1 %v98_v51 }
  0x51   :  { %801 = vmatpush3.msra.mxu1 %v98_v51  ;;  %234 = vmatprep.mubr.f32.mxu0 %v976_v0 }
  0x52   :  { %802 = vmatprep.subr.mxu1 %v95_v52  ;;  %378 = vmatprep.mubr.f32.mxu1 %v976_v0 }
  0x53   :  { %803 = vmatpush3.msra.mxu1 %v95_v52  ;;  %235 = vmatmul.mubr.f32.gmra.mxu0 %v48_v53 }
  0x54   :  { %379 = vmatmul.mubr.f32.gmra.mxu1 %v1045_v54  ;;  %804 = vmatprep.subr.mxu1 %v92_v55 }
  0x55   :  { %805 = vmatpush3.msra.mxu1 %v92_v55  ;;  %240 = vmatprep.mubr.f32.mxu0 %v976_v0 }
  0x56   :  { %806 = vmatprep.subr.mxu1 %v89_v56  ;;  %384 = vmatprep.mubr.f32.mxu1 %v976_v0 }
  0x57   :  { %807 = vmatpush3.msra.mxu1 %v89_v56  ;;  %241 = vmatmul.mubr.f32.gmra.mxu0 %v49_v57 }
  0x58   :  { %385 = vmatmul.mubr.f32.gmra.mxu1 %v1050_v58  ;;  %808 = vmatprep.subr.mxu1 %v86_v59 }
  0x59   :  { %809 = vmatpush3.msra.mxu1 %v86_v59  ;;  %246 = vmatprep.mubr.f32.mxu0 %v976_v0 }
  0x5a   :  { %810 = vmatprep.subr.mxu1 %v83_v60  ;;  %390 = vmatprep.mubr.f32.mxu1 %v976_v0 }
  0x5b   :  { %811 = vmatpush3.msra.mxu1 %v83_v60  ;;  %247 = vmatmul.mubr.f32.gmra.mxu0 %v50_v61 }
  0x5c   :  { %391 = vmatmul.mubr.f32.gmra.mxu1 %v1055_v62  ;;  %812 = vmatprep.subr.mxu1 %v80_v63 }
  0x5d   :  { %813 = vmatpush3.msra.mxu1 %v80_v63  ;;  %252 = vmatprep.mubr.f32.mxu0 %v976_v0 }
  0x5e   :  { %814 = vmatprep.subr.mxu1 %v77_v1  ;;  %816 = vmatprep.mubr.f32.mxu1 %v1009_v33 }
  0x5f   :  { %815 = vmatpush3.msra.mxu1 %v77_v1  ;;  %253 = vmatmul.mubr.f32.gmra.mxu0 %v51_v2 }
  0x60   :  { %817 = vmatmul.mubr.f32.vlgmr.msra.gmra.mxu1 %v1016_v37  ;;  %258 = vmatprep.mubr.f32.mxu0 %v976_v0 }
  0x61   :  { %819 = vmatprep.mubr.f32.mxu1 %v1023_v41 }
  0x63   :  { %259 = vmatmul.mubr.f32.gmra.mxu0 %v52_v3 }
  0x64   :  { %820 = vmatmul.mubr.f32.gmra.mxu1 %v1031_v45  ;;  %264 = vmatprep.mubr.f32.mxu0 %v976_v0 }
  0x65   :  { %822 = vmatprep.mubr.f32.mxu1 %v47_v49 }
  0x67   :  { %265 = vmatmul.mubr.f32.gmra.mxu0 %v53_v4 }
  0x68   :  { %823 = vmatmul.mubr.f32.gmra.mxu1 %v48_v53  ;;  %270 = vmatprep.mubr.f32.mxu0 %v976_v0 }
  0x69   :  { %825 = vmatprep.mubr.f32.mxu1 %v49_v57 }
  0x6b   :  { %271 = vmatmul.mubr.f32.gmra.mxu0 %v54_v5 }
  0x6c   :  { %826 = vmatmul.mubr.f32.gmra.mxu1 %v50_v61  ;;  %276 = vmatprep.mubr.f32.mxu0 %v976_v0 }
  0x6d   :  { %828 = vmatprep.mubr.f32.mxu1 %v51_v2 }
  0x6f   :  { %277 = vmatmul.mubr.f32.gmra.mxu0 %v55_v6 }
  0x70   :  { %829 = vmatmul.mubr.f32.gmra.mxu1 %v52_v3  ;;  %282 = vmatprep.mubr.f32.mxu0 %v976_v0 }
  0x71   :  { %831 = vmatprep.mubr.f32.mxu1 %v53_v4 }
  0x73   :  { %283 = vmatmul.mubr.f32.gmra.mxu0 %v56_v7 }
  0x74   :  { %832 = vmatmul.mubr.f32.gmra.mxu1 %v54_v5  ;;  %288 = vmatprep.mubr.f32.mxu0 %v976_v0 }
  0x75   :  { %834 = vmatprep.mubr.f32.mxu1 %v55_v6 }
  0x77   :  { %289 = vmatmul.mubr.f32.gmra.mxu0 %v57_v8 }
  0x78   :  { %835 = vmatmul.mubr.f32.gmra.mxu1 %v56_v7  ;;  %294 = vmatprep.mubr.f32.mxu0 %v976_v0 }
  0x79   :  { %837 = vmatprep.mubr.f32.mxu1 %v57_v8 }
  0x7b   :  { %295 = vmatmul.mubr.f32.gmra.mxu0 %v58_v9 }
  0x7c   :  { %838 = vmatmul.mubr.f32.gmra.mxu1 %v58_v9  ;;  %300 = vmatprep.mubr.f32.mxu0 %v976_v0 }
  0x7d   :  { %840 = vmatprep.mubr.f32.mxu1 %v59_v10 }
  0x7f   :  { %301 = vmatmul.mubr.f32.gmra.mxu0 %v59_v10 }
  0x80   :  { %841 = vmatmul.mubr.f32.gmra.mxu1 %v60_v11  ;;  %306 = vmatprep.mubr.f32.mxu0 %v976_v0 }
  0x81   :  { %843 = vmatprep.mubr.f32.mxu1 %v61_v12 }
  0x83   :  { %307 = vmatmul.mubr.f32.gmra.mxu0 %v60_v11 }
  0x84   :  { %844 = vmatmul.mubr.f32.gmra.mxu1 %v62_v13  ;;  %312 = vmatprep.mubr.f32.mxu0 %v976_v0 }
  0x85   :  { %846 = vmatprep.mubr.f32.mxu1 %v63_v14 }
  0x87   :  { %313 = vmatmul.mubr.f32.gmra.mxu0 %v61_v12 }
  0x88   :  { %847 = vmatmul.mubr.f32.gmra.mxu1 %v64_v15  ;;  %318 = vmatprep.mubr.f32.mxu0 %v976_v0 }
  0x89   :  { %849 = vmatprep.mubr.f32.mxu1 %v65_v16 }
  0x8b   :  { %319 = vmatmul.mubr.f32.gmra.mxu0 %v62_v13 }
  0x8c   :  { %850 = vmatmul.mubr.f32.gmra.mxu1 %v66_v17  ;;  %324 = vmatprep.mubr.f32.mxu0 %v976_v0 }
  0x8d   :  { %852 = vmatprep.mubr.f32.mxu1 %v1011_v34 }
  0x8f   :  { %325 = vmatmul.mubr.f32.gmra.mxu0 %v63_v14  ;;  %v135_v14 = vsub.s32 2, %v1087_v19 }
  0x90   :  { %853 = vmatmul.mubr.f32.gmra.mxu1 %v1019_v38  ;;  %330 = vmatprep.mubr.f32.mxu0 %v976_v0 }
  0x91   :  { %855 = vmatprep.mubr.f32.mxu1 %v1026_v42 }
  0x93   :  { %331 = vmatmul.mubr.f32.gmra.mxu0 %v64_v15 }
  0x94   :  { %856 = vmatmul.mubr.f32.gmra.mxu1 %v1034_v46  ;;  %336 = vmatprep.mubr.f32.mxu0 %v976_v0 }
  0x95   :  { %858 = vmatprep.mubr.f32.mxu1 %v1040_v50 }
  0x97   :  { %337 = vmatmul.mubr.f32.gmra.mxu0 %v65_v16 }
  0x98   :  { %859 = vmatmul.mubr.f32.gmra.mxu1 %v1045_v54  ;;  %342 = vmatprep.mubr.f32.mxu0 %v976_v0  ;;  %v1100_v0 = vrot.slane %v1093_v21, %v131_v22 }
  0x99   :  { %861 = vmatprep.mubr.f32.mxu1 %v1050_v58 }
  0x9b   :  { %343 = vmatmul.mubr.f32.gmra.mxu0 %v66_v17 }
  0x9c   :  { %862 = vmatmul.mubr.f32.gmra.mxu1 %v1055_v62 }
  0xff   :  { %v206_v24 = vpop.f32.mrf.mxu0  ;;  %v350_v25 = vpop.f32.mrf.mxu1 }
 0x100   :  { %v207_v26 = vadd.f32 %v206_v24, %v1097_v23  ;;  %v351_v27 = vadd.f32 %v350_v25, %v1097_v23 }
 0x101   :  { %v208_v28 = vpop.f32.mrf.mxu0  ;;  %v352_v29 = vpop.f32.mrf.mxu1 }
 0x102   :  { %622 = vst [vmem:[#allocation7] sm:$0xff] %v207_v26  ;;  %694 = vst [vmem:[#allocation7 + $0x240] sm:$0xff] %v351_v27  ;;  %v209_v30 = vadd.f32 %v208_v28, %v1100_v0  ;;  %v353_v31 = vadd.f32 %v352_v29, %v1100_v0  ;;  %v1134_v26 = vrot.slane %v1093_v21, %v135_v14 }
 0x103   :  { %v212_v32 = vpop.f32.mrf.mxu0 }
 0x104   :  { %623 = vst [vmem:[#allocation7 + $0x8] sm:$0xff] %v209_v30  ;;  %695 = vst [vmem:[#allocation7 + $0x248] sm:$0xff] %v353_v31  ;;  %v213_v33 = vadd.f32 %v212_v32, %v1097_v23  ;;  %v356_v34 = vpop.f32.mrf.mxu1 }
 0x105   :  { %v357_v35 = vadd.f32 %v356_v34, %v1097_v23  ;;  %v214_v36 = vpop.f32.mrf.mxu0 }
 0x106   :  { %625 = vst [vmem:[#allocation7 + $0x18] sm:$0xff] %v213_v33  ;;  %v215_v37 = vadd.f32 %v214_v36, %v1100_v0  ;;  %v358_v38 = vpop.f32.mrf.mxu1 }
 0x107   :  { %697 = vst [vmem:[#allocation7 + $0x258] sm:$0xff] %v357_v35  ;;  %v359_v39 = vadd.f32 %v358_v38, %v1100_v0  ;;  %v218_v40 = vpop.f32.mrf.mxu0 }
 0x108   :  { %626 = vst [vmem:[#allocation7 + $0x20] sm:$0xff] %v215_v37  ;;  %v219_v41 = vadd.f32 %v218_v40, %v1097_v23  ;;  %v362_v42 = vpop.f32.mrf.mxu1 }
 0x109   :  { %698 = vst [vmem:[#allocation7 + $0x260] sm:$0xff] %v359_v39  ;;  %v363_v43 = vadd.f32 %v362_v42, %v1097_v23  ;;  %v220_v44 = vpop.f32.mrf.mxu0 }
 0x10a   :  { %628 = vst [vmem:[#allocation7 + $0x30] sm:$0xff] %v219_v41  ;;  %v221_v45 = vadd.f32 %v220_v44, %v1100_v0  ;;  %v364_v46 = vpop.f32.mrf.mxu1 }
 0x10b   :  { %700 = vst [vmem:[#allocation7 + $0x270] sm:$0xff] %v363_v43  ;;  %v365_v47 = vadd.f32 %v364_v46, %v1100_v0  ;;  %v224_v48 = vpop.f32.mrf.mxu0 }
 0x10c   :  { %629 = vst [vmem:[#allocation7 + $0x38] sm:$0xff] %v221_v45  ;;  %v225_v49 = vadd.f32 %v224_v48, %v1097_v23  ;;  %v368_v50 = vpop.f32.mrf.mxu1 }
 0x10d   :  { %701 = vst [vmem:[#allocation7 + $0x278] sm:$0xff] %v365_v47  ;;  %v369_v51 = vadd.f32 %v368_v50, %v1097_v23  ;;  %v226_v52 = vpop.f32.mrf.mxu0 }
 0x10e   :  { %631 = vst [vmem:[#allocation7 + $0x48] sm:$0xff] %v225_v49  ;;  %v227_v53 = vadd.f32 %v226_v52, %v1100_v0  ;;  %v370_v54 = vpop.f32.mrf.mxu1 }
 0x10f   :  { %703 = vst [vmem:[#allocation7 + $0x288] sm:$0xff] %v369_v51  ;;  %v371_v55 = vadd.f32 %v370_v54, %v1100_v0  ;;  %v230_v56 = vpop.f32.mrf.mxu0 }
 0x110   :  { %632 = vst [vmem:[#allocation7 + $0x50] sm:$0xff] %v227_v53  ;;  %v231_v57 = vadd.f32 %v230_v56, %v1097_v23  ;;  %v374_v58 = vpop.f32.mrf.mxu1 }
 0x111   :  { %704 = vst [vmem:[#allocation7 + $0x290] sm:$0xff] %v371_v55  ;;  %v375_v59 = vadd.f32 %v374_v58, %v1097_v23  ;;  %v232_v60 = vpop.f32.mrf.mxu0 }
 0x112   :  { %634 = vst [vmem:[#allocation7 + $0x60] sm:$0xff] %v231_v57  ;;  %v233_v61 = vadd.f32 %v232_v60, %v1100_v0  ;;  %v376_v62 = vpop.f32.mrf.mxu1 }
 0x113   :  { %706 = vst [vmem:[#allocation7 + $0x2a0] sm:$0xff] %v375_v59  ;;  %v377_v63 = vadd.f32 %v376_v62, %v1100_v0  ;;  %v236_v1 = vpop.f32.mrf.mxu0 }
 0x114   :  { %635 = vst [vmem:[#allocation7 + $0x68] sm:$0xff] %v233_v61  ;;  %v237_v2 = vadd.f32 %v236_v1, %v1097_v23  ;;  %v380_v3 = vpop.f32.mrf.mxu1 }
 0x115   :  { %707 = vst [vmem:[#allocation7 + $0x2a8] sm:$0xff] %v377_v63  ;;  %v381_v4 = vadd.f32 %v380_v3, %v1097_v23  ;;  %v238_v5 = vpop.f32.mrf.mxu0 }
 0x116   :  { %637 = vst [vmem:[#allocation7 + $0x78] sm:$0xff] %v237_v2  ;;  %v239_v6 = vadd.f32 %v238_v5, %v1100_v0  ;;  %v382_v7 = vpop.f32.mrf.mxu1 }
 0x117   :  { %709 = vst [vmem:[#allocation7 + $0x2b8] sm:$0xff] %v381_v4  ;;  %v383_v8 = vadd.f32 %v382_v7, %v1100_v0  ;;  %v242_v9 = vpop.f32.mrf.mxu0 }
 0x118   :  { %638 = vst [vmem:[#allocation7 + $0x80] sm:$0xff] %v239_v6  ;;  %v243_v10 = vadd.f32 %v242_v9, %v1097_v23  ;;  %v386_v11 = vpop.f32.mrf.mxu1 }
 0x119   :  { %710 = vst [vmem:[#allocation7 + $0x2c0] sm:$0xff] %v383_v8  ;;  %v387_v12 = vadd.f32 %v386_v11, %v1097_v23  ;;  %v244_v13 = vpop.f32.mrf.mxu0 }
 0x11a   :  { %640 = vst [vmem:[#allocation7 + $0x90] sm:$0xff] %v243_v10  ;;  %v245_v15 = vadd.f32 %v244_v13, %v1100_v0  ;;  %v388_v16 = vpop.f32.mrf.mxu1 }
 0x11b   :  { %712 = vst [vmem:[#allocation7 + $0x2d0] sm:$0xff] %v387_v12  ;;  %v389_v17 = vadd.f32 %v388_v16, %v1100_v0  ;;  %v248_v18 = vpop.f32.mrf.mxu0 }
 0x11c   :  { %641 = vst [vmem:[#allocation7 + $0x98] sm:$0xff] %v245_v15  ;;  %v249_v20 = vadd.f32 %v248_v18, %v1097_v23  ;;  %v392_v22 = vpop.f32.mrf.mxu1 }
 0x11d   :  { %713 = vst [vmem:[#allocation7 + $0x2d8] sm:$0xff] %v389_v17  ;;  %v393_v24 = vadd.f32 %v392_v22, %v1097_v23  ;;  %v250_v25 = vpop.f32.mrf.mxu0 }
 0x11e   :  { %643 = vst [vmem:[#allocation7 + $0xa8] sm:$0xff] %v249_v20  ;;  %v251_v19 = vadd.f32 %v250_v25, %v1100_v0  ;;  %v394_v27 = vpop.f32.mrf.mxu1 }
 0x11f   :  { %715 = vst [vmem:[#allocation7 + $0x2e8] sm:$0xff] %v393_v24  ;;  %v395_v28 = vadd.f32 %v394_v27, %v1100_v0  ;;  %v254_v29 = vpop.f32.mrf.mxu0 }
 0x120   :  { %644 = vst [vmem:[#allocation7 + $0xb0] sm:$0xff] %v251_v19  ;;  %v255_v30 = vadd.f32 %v254_v29, %v1097_v23  ;;  %v818_v31 = vpop.f32.mrf.mxu1 }
 0x121   :  { %716 = vst [vmem:[#allocation7 + $0x2f0] sm:$0xff] %v395_v28  ;;  %v469_v32 = vadd.f32 %v818_v31, %v1134_v26  ;;  %v256_v33 = vpop.f32.mrf.mxu0 }
 0x122   :  { %646 = vst [vmem:[#allocation7 + $0xc0] sm:$0xff] %v255_v30  ;;  %v257_v21 = vadd.f32 %v256_v33, %v1100_v0  ;;  %v463_v34 = vpop.f32.mrf.mxu1 }
 0x123   :  { %627 = vst [vmem:[#allocation7 + $0x28] sm:$0xff] %v469_v32  ;;  %v464_v35 = vadd.f32 %v463_v34, %v1134_v26  ;;  %v260_v36 = vpop.f32.mrf.mxu0 }
 0x124   :  { %647 = vst [vmem:[#allocation7 + $0xc8] sm:$0xff] %v257_v21  ;;  %v261_v37 = vadd.f32 %v260_v36, %v1097_v23  ;;  %v821_v38 = vpop.f32.mrf.mxu1 }
 0x125   :  { %624 = vst [vmem:[#allocation7 + $0x10] sm:$0xff] %v464_v35  ;;  %v479_v39 = vadd.f32 %v821_v38, %v1134_v26  ;;  %v262_v40 = vpop.f32.mrf.mxu0 }
 0x126   :  { %649 = vst [vmem:[#allocation7 + $0xd8] sm:$0xff] %v261_v37  ;;  %v263_v41 = vadd.f32 %v262_v40, %v1100_v0  ;;  %v473_v42 = vpop.f32.mrf.mxu1 }
 0x127   :  { %633 = vst [vmem:[#allocation7 + $0x58] sm:$0xff] %v479_v39  ;;  %v474_v43 = vadd.f32 %v473_v42, %v1134_v26  ;;  %v266_v44 = vpop.f32.mrf.mxu0 }
 0x128   :  { %650 = vst [vmem:[#allocation7 + $0xe0] sm:$0xff] %v263_v41  ;;  %v267_v45 = vadd.f32 %v266_v44, %v1097_v23  ;;  %v824_v46 = vpop.f32.mrf.mxu1 }
 0x129   :  { %630 = vst [vmem:[#allocation7 + $0x40] sm:$0xff] %v474_v43  ;;  %v489_v47 = vadd.f32 %v824_v46, %v1134_v26  ;;  %v268_v48 = vpop.f32.mrf.mxu0 }
 0x12a   :  { %652 = vst [vmem:[#allocation7 + $0xf0] sm:$0xff] %v267_v45  ;;  %v269_v49 = vadd.f32 %v268_v48, %v1100_v0  ;;  %v483_v50 = vpop.f32.mrf.mxu1 }
 0x12b   :  { %639 = vst [vmem:[#allocation7 + $0x88] sm:$0xff] %v489_v47  ;;  %v484_v51 = vadd.f32 %v483_v50, %v1134_v26  ;;  %v272_v52 = vpop.f32.mrf.mxu0 }
 0x12c   :  { %653 = vst [vmem:[#allocation7 + $0xf8] sm:$0xff] %v269_v49  ;;  %v273_v53 = vadd.f32 %v272_v52, %v1097_v23  ;;  %v827_v54 = vpop.f32.mrf.mxu1 }
 0x12d   :  { %636 = vst [vmem:[#allocation7 + $0x70] sm:$0xff] %v484_v51  ;;  %v499_v55 = vadd.f32 %v827_v54, %v1134_v26  ;;  %v274_v56 = vpop.f32.mrf.mxu0 }
 0x12e   :  { %655 = vst [vmem:[#allocation7 + $0x108] sm:$0xff] %v273_v53  ;;  %v275_v57 = vadd.f32 %v274_v56, %v1100_v0  ;;  %v493_v58 = vpop.f32.mrf.mxu1 }
 0x12f   :  { %645 = vst [vmem:[#allocation7 + $0xb8] sm:$0xff] %v499_v55  ;;  %v494_v59 = vadd.f32 %v493_v58, %v1134_v26  ;;  %v278_v60 = vpop.f32.mrf.mxu0 }
 0x130   :  { %656 = vst [vmem:[#allocation7 + $0x110] sm:$0xff] %v275_v57  ;;  %v279_v61 = vadd.f32 %v278_v60, %v1097_v23  ;;  %v830_v62 = vpop.f32.mrf.mxu1 }
 0x131   :  { %642 = vst [vmem:[#allocation7 + $0xa0] sm:$0xff] %v494_v59  ;;  %v509_v63 = vadd.f32 %v830_v62, %v1134_v26  ;;  %v280_v1 = vpop.f32.mrf.mxu0 }
 0x132   :  { %658 = vst [vmem:[#allocation7 + $0x120] sm:$0xff] %v279_v61  ;;  %v281_v2 = vadd.f32 %v280_v1, %v1100_v0  ;;  %v503_v3 = vpop.f32.mrf.mxu1 }
 0x133   :  { %651 = vst [vmem:[#allocation7 + $0xe8] sm:$0xff] %v509_v63  ;;  %v504_v4 = vadd.f32 %v503_v3, %v1134_v26  ;;  %v284_v5 = vpop.f32.mrf.mxu0 }
 0x134   :  { %659 = vst [vmem:[#allocation7 + $0x128] sm:$0xff] %v281_v2  ;;  %v285_v6 = vadd.f32 %v284_v5, %v1097_v23  ;;  %v833_v7 = vpop.f32.mrf.mxu1 }
 0x135   :  { %648 = vst [vmem:[#allocation7 + $0xd0] sm:$0xff] %v504_v4  ;;  %v519_v8 = vadd.f32 %v833_v7, %v1134_v26  ;;  %v286_v9 = vpop.f32.mrf.mxu0 }
 0x136   :  { %661 = vst [vmem:[#allocation7 + $0x138] sm:$0xff] %v285_v6  ;;  %v287_v10 = vadd.f32 %v286_v9, %v1100_v0  ;;  %v513_v11 = vpop.f32.mrf.mxu1 }
 0x137   :  { %657 = vst [vmem:[#allocation7 + $0x118] sm:$0xff] %v519_v8  ;;  %v514_v12 = vadd.f32 %v513_v11, %v1134_v26  ;;  %v290_v13 = vpop.f32.mrf.mxu0 }
 0x138   :  { %662 = vst [vmem:[#allocation7 + $0x140] sm:$0xff] %v287_v10  ;;  %v291_v14 = vadd.f32 %v290_v13, %v1097_v23  ;;  %v836_v15 = vpop.f32.mrf.mxu1 }
 0x139   :  { %654 = vst [vmem:[#allocation7 + $0x100] sm:$0xff] %v514_v12  ;;  %v529_v16 = vadd.f32 %v836_v15, %v1134_v26  ;;  %v292_v17 = vpop.f32.mrf.mxu0 }
 0x13a   :  { %664 = vst [vmem:[#allocation7 + $0x150] sm:$0xff] %v291_v14  ;;  %v293_v18 = vadd.f32 %v292_v17, %v1100_v0  ;;  %v523_v20 = vpop.f32.mrf.mxu1 }
 0x13b   :  { %663 = vst [vmem:[#allocation7 + $0x148] sm:$0xff] %v529_v16  ;;  %v524_v22 = vadd.f32 %v523_v20, %v1134_v26  ;;  %v296_v24 = vpop.f32.mrf.mxu0 }
 0x13c   :  { %665 = vst [vmem:[#allocation7 + $0x158] sm:$0xff] %v293_v18  ;;  %v297_v25 = vadd.f32 %v296_v24, %v1097_v23  ;;  %v839_v19 = vpop.f32.mrf.mxu1 }
 0x13d   :  { %660 = vst [vmem:[#allocation7 + $0x130] sm:$0xff] %v524_v22  ;;  %v539_v27 = vadd.f32 %v839_v19, %v1134_v26  ;;  %v298_v28 = vpop.f32.mrf.mxu0 }
 0x13e   :  { %667 = vst [vmem:[#allocation7 + $0x168] sm:$0xff] %v297_v25  ;;  %v299_v29 = vadd.f32 %v298_v28, %v1100_v0  ;;  %v533_v30 = vpop.f32.mrf.mxu1 }
 0x13f   :  { %669 = vst [vmem:[#allocation7 + $0x178] sm:$0xff] %v539_v27  ;;  %v534_v31 = vadd.f32 %v533_v30, %v1134_v26  ;;  %v302_v32 = vpop.f32.mrf.mxu0 }
 0x140   :  { %668 = vst [vmem:[#allocation7 + $0x170] sm:$0xff] %v299_v29  ;;  %v303_v33 = vadd.f32 %v302_v32, %v1097_v23  ;;  %v842_v21 = vpop.f32.mrf.mxu1 }
 0x141   :  { %666 = vst [vmem:[#allocation7 + $0x160] sm:$0xff] %v534_v31  ;;  %v549_v34 = vadd.f32 %v842_v21, %v1134_v26  ;;  %v304_v35 = vpop.f32.mrf.mxu0 }
 0x142   :  { %670 = vst [vmem:[#allocation7 + $0x180] sm:$0xff] %v303_v33  ;;  %v305_v36 = vadd.f32 %v304_v35, %v1100_v0  ;;  %v543_v37 = vpop.f32.mrf.mxu1 }
 0x143   :  { %675 = vst [vmem:[#allocation7 + $0x1a8] sm:$0xff] %v549_v34  ;;  %v544_v38 = vadd.f32 %v543_v37, %v1134_v26  ;;  %v308_v39 = vpop.f32.mrf.mxu0 }
 0x144   :  { %671 = vst [vmem:[#allocation7 + $0x188] sm:$0xff] %v305_v36  ;;  %v309_v40 = vadd.f32 %v308_v39, %v1097_v23  ;;  %v845_v41 = vpop.f32.mrf.mxu1 }
 0x145   :  { %672 = vst [vmem:[#allocation7 + $0x190] sm:$0xff] %v544_v38  ;;  %v559_v42 = vadd.f32 %v845_v41, %v1134_v26  ;;  %v310_v43 = vpop.f32.mrf.mxu0 }
 0x146   :  { %673 = vst [vmem:[#allocation7 + $0x198] sm:$0xff] %v309_v40  ;;  %v311_v44 = vadd.f32 %v310_v43, %v1100_v0  ;;  %v553_v45 = vpop.f32.mrf.mxu1 }
 0x147   :  { %681 = vst [vmem:[#allocation7 + $0x1d8] sm:$0xff] %v559_v42  ;;  %v554_v46 = vadd.f32 %v553_v45, %v1134_v26  ;;  %v314_v47 = vpop.f32.mrf.mxu0 }
 0x148   :  { %674 = vst [vmem:[#allocation7 + $0x1a0] sm:$0xff] %v311_v44  ;;  %v315_v48 = vadd.f32 %v314_v47, %v1097_v23  ;;  %v848_v49 = vpop.f32.mrf.mxu1 }
 0x149   :  { %678 = vst [vmem:[#allocation7 + $0x1c0] sm:$0xff] %v554_v46  ;;  %v569_v50 = vadd.f32 %v848_v49, %v1134_v26  ;;  %v316_v51 = vpop.f32.mrf.mxu0 }
 0x14a   :  { %676 = vst [vmem:[#allocation7 + $0x1b0] sm:$0xff] %v315_v48  ;;  %v317_v52 = vadd.f32 %v316_v51, %v1100_v0  ;;  %v563_v53 = vpop.f32.mrf.mxu1 }
 0x14b   :  { %687 = vst [vmem:[#allocation7 + $0x208] sm:$0xff] %v569_v50  ;;  %v564_v54 = vadd.f32 %v563_v53, %v1134_v26  ;;  %v320_v55 = vpop.f32.mrf.mxu0 }
 0x14c   :  { %677 = vst [vmem:[#allocation7 + $0x1b8] sm:$0xff] %v317_v52  ;;  %v321_v56 = vadd.f32 %v320_v55, %v1097_v23  ;;  %v851_v57 = vpop.f32.mrf.mxu1 }
 0x14d   :  { %684 = vst [vmem:[#allocation7 + $0x1f0] sm:$0xff] %v564_v54  ;;  %v579_v58 = vadd.f32 %v851_v57, %v1134_v26  ;;  %v322_v59 = vpop.f32.mrf.mxu0 }
 0x14e   :  { %679 = vst [vmem:[#allocation7 + $0x1c8] sm:$0xff] %v321_v56  ;;  %v323_v60 = vadd.f32 %v322_v59, %v1100_v0  ;;  %v573_v61 = vpop.f32.mrf.mxu1 }
 0x14f   :  { %693 = vst [vmem:[#allocation7 + $0x238] sm:$0xff] %v579_v58  ;;  %v574_v62 = vadd.f32 %v573_v61, %v1134_v26  ;;  %v326_v63 = vpop.f32.mrf.mxu0 }
 0x150   :  { %680 = vst [vmem:[#allocation7 + $0x1d0] sm:$0xff] %v323_v60  ;;  %v327_v1 = vadd.f32 %v326_v63, %v1097_v23  ;;  %v854_v2 = vpop.f32.mrf.mxu1 }
 0x151   :  { %690 = vst [vmem:[#allocation7 + $0x220] sm:$0xff] %v574_v62  ;;  %v589_v3 = vadd.f32 %v854_v2, %v1134_v26  ;;  %v328_v4 = vpop.f32.mrf.mxu0 }
 0x152   :  { %682 = vst [vmem:[#allocation7 + $0x1e0] sm:$0xff] %v327_v1  ;;  %v329_v5 = vadd.f32 %v328_v4, %v1100_v0  ;;  %v583_v6 = vpop.f32.mrf.mxu1 }
 0x153   :  { %699 = vst [vmem:[#allocation7 + $0x268] sm:$0xff] %v589_v3  ;;  %v584_v7 = vadd.f32 %v583_v6, %v1134_v26  ;;  %v332_v8 = vpop.f32.mrf.mxu0 }
 0x154   :  { %683 = vst [vmem:[#allocation7 + $0x1e8] sm:$0xff] %v329_v5  ;;  %v333_v9 = vadd.f32 %v332_v8, %v1097_v23  ;;  %v857_v10 = vpop.f32.mrf.mxu1 }
 0x155   :  { %696 = vst [vmem:[#allocation7 + $0x250] sm:$0xff] %v584_v7  ;;  %v599_v11 = vadd.f32 %v857_v10, %v1134_v26  ;;  %v334_v12 = vpop.f32.mrf.mxu0 }
 0x156   :  { %685 = vst [vmem:[#allocation7 + $0x1f8] sm:$0xff] %v333_v9  ;;  %v335_v13 = vadd.f32 %v334_v12, %v1100_v0  ;;  %v593_v14 = vpop.f32.mrf.mxu1 }
 0x157   :  { %705 = vst [vmem:[#allocation7 + $0x298] sm:$0xff] %v599_v11  ;;  %v594_v15 = vadd.f32 %v593_v14, %v1134_v26  ;;  %v338_v16 = vpop.f32.mrf.mxu0 }
 0x158   :  { %686 = vst [vmem:[#allocation7 + $0x200] sm:$0xff] %v335_v13  ;;  %v339_v17 = vadd.f32 %v338_v16, %v1097_v23  ;;  %v860_v18 = vpop.f32.mrf.mxu1 }
 0x159   :  { %702 = vst [vmem:[#allocation7 + $0x280] sm:$0xff] %v594_v15  ;;  %v609_v20 = vadd.f32 %v860_v18, %v1134_v26  ;;  %v340_v22 = vpop.f32.mrf.mxu0 }
 0x15a   :  { %688 = vst [vmem:[#allocation7 + $0x210] sm:$0xff] %v339_v17  ;;  %v341_v24 = vadd.f32 %v340_v22, %v1100_v0  ;;  %v603_v25 = vpop.f32.mrf.mxu1 }
 0x15b   :  { %711 = vst [vmem:[#allocation7 + $0x2c8] sm:$0xff] %v609_v20  ;;  %v604_v19 = vadd.f32 %v603_v25, %v1134_v26  ;;  %v344_v27 = vpop.f32.mrf.mxu0 }
 0x15c   :  { %689 = vst [vmem:[#allocation7 + $0x218] sm:$0xff] %v341_v24  ;;  %v345_v28 = vadd.f32 %v344_v27, %v1097_v23  ;;  %v863_v29 = vpop.f32.mrf.mxu1 }
 0x15d   :  { %708 = vst [vmem:[#allocation7 + $0x2b0] sm:$0xff] %v604_v19  ;;  %v619_v30 = vadd.f32 %v863_v29, %v1134_v26  ;;  %v346_v31 = vpop.f32.mrf.mxu0 }
 0x15e   :  { %691 = vst [vmem:[#allocation7 + $0x228] sm:$0xff] %v345_v28  ;;  %v347_v32 = vadd.f32 %v346_v31, %v1100_v0  ;;  %v613_v33 = vpop.f32.mrf.mxu1 }
 0x15f   :  { %717 = vst [vmem:[#allocation7 + $0x2f8] sm:$0xff] %v619_v30  ;;  %v614_v21 = vadd.f32 %v613_v33, %v1134_v26 }
 0x160   :  { %692 = vst [vmem:[#allocation7 + $0x230] sm:$0xff] %v347_v32 }
 0x161   :  { %714 = vst [vmem:[#allocation7 + $0x2e0] sm:$0xff] %v614_v21 }
 0x162   :  { %955 = shalt.err (!%p952_p0)
}
 0x163   :  { %729 = dma.vmem_to_hbm [thread:$0]  %s724_s26, 12288, %s1211_s3, [#allocation4], %s974_s22, %s974_s22, %s975_s23  }
 0x164   :  { %968 = dma.done.wait [#allocation4], 12288  }
 0x165   :  { %969 = vsyncadd [#allocation4], 4294955008 }
 0x166   :  { %733 = vsyncpa [#allocation3], 1 }
 0x167   :  { %734 = vsyncpa [#allocation6], 1 }
 0x168   :  { %735 = vsyncpa [#allocation4], 1 }

</bundles_post_ra>
